<compile_context>
chip_gen: v7x
topology: tpu7x:2x2x1
jax: 0.10.0
libtpu: 0.0.40
codegen_flags: <defaults>
</compile_context>

<pallas_src>
import numpy as np
import jax
import jax.numpy as jnp
from jax.experimental import pallas as pl
from jax.experimental.pallas import tpu as pltpu


def _round_up(x, m):
    return (x + m - 1) // m * m


def rp_attention_kernel(params_ref, g_ref, rp_ref, val_ref):
    # params_ref: SMEM (S, 4)            [w0, w1, w2, mix_weight] per score
    # g_ref:      VMEM (S, 3, TR, 128)   spatial tile of the affinity graphs
    # rp_ref:     VMEM (TR, 128)         rp_graph tile (f32)
    # val_ref:    SMEM (1, 1)            per-tile raw relu-sum partial
    S = g_ref.shape[0]
    rp = jnp.zeros(rp_ref.shape, dtype=jnp.float32)
    vacc = jnp.zeros(rp_ref.shape, dtype=jnp.float32)

    # Static unroll: S (num_score) is small (3 here).
    # TODO(synk): for large S switch to lax.fori_loop(0, S, body, init,
    # unroll=True) to cap vreg live ranges while keeping LLO visibility.
    for i in range(S):
        w0 = params_ref[i, 0]
        w1 = params_ref[i, 1]
        w2 = params_ref[i, 2]
        mw = params_ref[i, 3]

        # Full tile-aligned (TR, 128) channel slabs; upcast covers the
        # optional bf16-in-HBM path (no bf16 vector math on v5e).
        g0 = g_ref[i, 0].astype(jnp.float32)
        g1 = g_ref[i, 1].astype(jnp.float32)
        g2 = g_ref[i, 2].astype(jnp.float32)

        # Shared reward/penalty partial sum, reused by both paths.
        t = w0 * g0 + w1 * g1

        # 1x1 conv (3 -> 1, no bias) + sigmoid, mixed into rp_graph.
        rp = rp + mw * jax.nn.sigmoid(t + w2 * g2)

        # cal_value numerator: relu(reward*g0 + penalty*g1); reduced after loop.
        vacc = vacc + jnp.maximum(t, 0.0)

    rp_ref[...] = rp
    # Single cross-lane reduction per tile; padded lanes contribute relu(0)=0.
    val_ref[0, 0] = jnp.sum(vacc)


def _weight_schedule(conv_weight, mix_weights, num_score):
    """Replicate CustomConv2d's in-forward weight mutation (float32, like torch).

    The same conv module is appended num_score times, so its (1,3,1,1) weight
    is mutated once per loop iteration; reward/penalty are read after the
    mutation of iteration i.
    """
    w = np.asarray(conv_weight, dtype=np.float32)
    w0 = np.float32(w[0, 0, 0, 0])
    w1 = np.float32(w[0, 1, 0, 0])
    w2 = np.float32(w[0, 2, 0, 0])
    mix = np.asarray(mix_weights, dtype=np.float32)
    rows = []
    for i in range(num_score):
        w1 = np.float32(-max(abs(w1), w1 + w2))
        w0 = np.float32(max(w0, w2))
        rows.append([w0, w1, w2, mix[i]])
    return np.asarray(rows, dtype=np.float32)


def rp_attention_forward(affinity_graphs, conv_weight, mix_weights, *,
                         tile_rows=512, input_dtype=jnp.float32):
    S, C, N, N2 = affinity_graphs.shape
    assert C == 3 and N == N2
    params = jnp.asarray(_weight_schedule(conv_weight, mix_weights, S))

    lanes = 128
    sub = 8 if input_dtype == jnp.float32 else 16  # sublane tile of input dtype
    n2 = N * N
    rows = pl.cdiv(n2, lanes)

    # Lane/sublane-dense spatial tiling: TR rows x 128 lanes per grid step.
    # tile_rows=512 keeps the double-buffered footprint small enough for
    # v7x's 64 MiB VMEM as well (no need to raise vmem_limit_bytes).
    tr = min(int(tile_rows), _round_up(rows, sub))
    tr = _round_up(tr, sub)
    rows_padded = _round_up(rows, tr)
    num_tiles = rows_padded // tr

    g = jnp.asarray(affinity_graphs).astype(input_dtype).reshape(S, C, n2)
    pad = rows_padded * lanes - n2
    if pad:
        g = jnp.pad(g, ((0, 0), (0, 0), (0, pad)))
    g = g.reshape(S, C, rows_padded, lanes)

    rp_pad, val_parts = pl.pallas_call(
        rp_attention_kernel,
        out_shape=(
            jax.ShapeDtypeStruct((rows_padded, lanes), jnp.float32),
            jax.ShapeDtypeStruct((num_tiles, 1), jnp.float32),
        ),
        grid=(num_tiles,),
        in_specs=[
            # Small scalar schedule: whole array resident in SMEM.
            pl.BlockSpec(memory_space=pltpu.MemorySpace.SMEM),
            # Affinity graphs: full (S, 3) slab per spatial tile.
            pl.BlockSpec((S, C, tr, lanes), lambda t: (0, 0, t, 0)),
        ],
        out_specs=(
            pl.BlockSpec((tr, lanes), lambda t: (t, 0)),
            pl.BlockSpec((1, 1), lambda t: (t, 0),
                         memory_space=pltpu.MemorySpace.SMEM),
        ),
        compiler_params=pltpu.CompilerParams(
            dimension_semantics=("parallel",),
        ),
    )(params, g)

    # Padded rp lanes carry mw*sigmoid(0); keep this slice.
    rp = rp_pad.reshape(-1)[:n2].reshape(N, N)
    value = jnp.sum(val_parts) / jnp.float32(n2)  # args.num_subjects ** 2
    # TODO(synk): for many tiny RP_Attention instances, batch several graph
    # stacks into one pallas_call (extra "parallel" batch axis) to amortize
    # the fixed launch/DMA cost that dominates at this size.
    return rp, value


def rp_attention_reference(affinity_graphs, conv_weight, mix_weights):
    g = np.asarray(affinity_graphs, dtype=np.float32)
    S, _, N, _ = g.shape
    rows = _weight_schedule(conv_weight, mix_weights, S)
    rp = np.zeros((N, N), dtype=np.float32)
    value = 0.0
    for i in range(S):
        w0, w1, w2, mw = [float(v) for v in rows[i]]
        pre = w0 * g[i, 0] + w1 * g[i, 1] + w2 * g[i, 2]
        rp += mw * (1.0 / (1.0 + np.exp(-pre)))
        value += np.sum(np.maximum(w0 * g[i, 0] + w1 * g[i, 1], 0.0)) / (N * N)
    return rp, np.float32(value)


if __name__ == "__main__":
    num_score = 3        # len(args.scores)
    num_subjects = 16    # args.num_subjects -> N x N affinity graphs

    key = jax.random.PRNGKey(0)
    k_g, k_w, k_mix = jax.random.split(key, 3)

    # affinity_graphs: (num_score, 3, N, N)
    affinity_graphs = jax.random.uniform(
        k_g, (num_score, 3, num_subjects, num_subjects), dtype=jnp.float32)

    # CustomConv2d init: weight (1, 3, 1, 1), abs(), channel 1 negated
    conv_weight = jnp.abs(jax.random.uniform(k_w, (1, 3, 1, 1), dtype=jnp.float32))
    conv_weight = conv_weight.at[:, 1, :, :].set(-conv_weight[:, 1, :, :])

    # RP_Attention mixing weights: rand(num_score) normalized to sum 1
    mix = jax.random.uniform(k_mix, (num_score,), dtype=jnp.float32)
    mix = mix / jnp.sum(mix)

    # f32 path (tight check against the NumPy reference).
    rp_graph, value = rp_attention_forward(affinity_graphs, conv_weight, mix)
    rp_graph = jax.block_until_ready(rp_graph)
    value = jax.block_until_ready(value)

    rp_ref, val_ref = rp_attention_reference(
        np.asarray(affinity_graphs), np.asarray(conv_weight), np.asarray(mix))
    assert np.allclose(np.asarray(rp_graph), rp_ref, rtol=1e-4, atol=1e-5)
    assert np.allclose(float(value), float(val_ref), rtol=1e-4, atol=1e-5)

    # bf16-in-HBM bandwidth path (in-kernel upcast); looser tolerance.
    rp_bf16, val_bf16 = rp_attention_forward(
        affinity_graphs, conv_weight, mix, input_dtype=jnp.bfloat16)
    rp_bf16 = jax.block_until_ready(rp_bf16)
    val_bf16 = jax.block_until_ready(val_bf16)
    assert np.allclose(np.asarray(rp_bf16), rp_ref, rtol=5e-2, atol=5e-2)
    assert np.allclose(float(val_bf16), float(val_ref), rtol=5e-2, atol=5e-2)

    print("KERNEL_OK")
</pallas_src>

<mosaic_0001>
module attributes {stable_mosaic.version = 11 : i64} {
  func.func @rp_attention_kernel(%arg0: i32, %arg1: memref<3x4xf32, #tpu.memory_space<smem>>, %arg2: memref<3x3x8x128xf32, #tpu.memory_space<vmem>>, %arg3: memref<8x128xf32, #tpu.memory_space<vmem>>, %arg4: memref<1x1xf32, #tpu.memory_space<smem>>) attributes {dimension_semantics = [#tpu.dimension_semantics<parallel>], iteration_bounds = array<i64: 1>, scalar_prefetch = 0 : i64, scratch_operands = 0 : i64, tpu.core_type = #tpu.core_type<tc>, window_params = [{transform_indices = @transform_0, window_bounds = array<i64: 3, 4>}, {transform_indices = @transform_1, window_bounds = array<i64: 3, 3, 8, 128>}, {transform_indices = @transform_2, window_bounds = array<i64: 8, 128>}, {transform_indices = @transform_3, window_bounds = array<i64: 1, 1>}]} {
    %cst = arith.constant 0.000000e+00 : f32
    %0 = vector.broadcast %cst : f32 to vector<8x128xf32>
    %cst_0 = arith.constant 0.000000e+00 : f32
    %1 = vector.broadcast %cst_0 : f32 to vector<8x128xf32>
    %c0 = arith.constant 0 : index
    %c0_1 = arith.constant 0 : index
    %2 = memref.load %arg1[%c0, %c0_1] : memref<3x4xf32, #tpu.memory_space<smem>>
    %c0_2 = arith.constant 0 : index
    %c1 = arith.constant 1 : index
    %3 = memref.load %arg1[%c0_2, %c1] : memref<3x4xf32, #tpu.memory_space<smem>>
    %c0_3 = arith.constant 0 : index
    %c2 = arith.constant 2 : index
    %4 = memref.load %arg1[%c0_3, %c2] : memref<3x4xf32, #tpu.memory_space<smem>>
    %c0_4 = arith.constant 0 : index
    %c3 = arith.constant 3 : index
    %5 = memref.load %arg1[%c0_4, %c3] : memref<3x4xf32, #tpu.memory_space<smem>>
    %c0_5 = arith.constant 0 : index
    %c0_6 = arith.constant 0 : index
    %c0_7 = arith.constant 0 : index
    %c0_8 = arith.constant 0 : index
    %6 = vector.load %arg2[%c0_5, %c0_6, %c0_7, %c0_8] : memref<3x3x8x128xf32, #tpu.memory_space<vmem>>, vector<1x1x8x128xf32>
    %7 = vector.shape_cast %6 : vector<1x1x8x128xf32> to vector<8x128xf32>
    %c0_9 = arith.constant 0 : index
    %c1_10 = arith.constant 1 : index
    %c0_11 = arith.constant 0 : index
    %c0_12 = arith.constant 0 : index
    %8 = vector.load %arg2[%c0_9, %c1_10, %c0_11, %c0_12] : memref<3x3x8x128xf32, #tpu.memory_space<vmem>>, vector<1x1x8x128xf32>
    %9 = vector.shape_cast %8 : vector<1x1x8x128xf32> to vector<8x128xf32>
    %c0_13 = arith.constant 0 : index
    %c2_14 = arith.constant 2 : index
    %c0_15 = arith.constant 0 : index
    %c0_16 = arith.constant 0 : index
    %10 = vector.load %arg2[%c0_13, %c2_14, %c0_15, %c0_16] : memref<3x3x8x128xf32, #tpu.memory_space<vmem>>, vector<1x1x8x128xf32>
    %11 = vector.shape_cast %10 : vector<1x1x8x128xf32> to vector<8x128xf32>
    %12 = vector.broadcast %2 : f32 to vector<8x128xf32>
    %13 = arith.mulf %12, %7 : vector<8x128xf32>
    %14 = vector.broadcast %3 : f32 to vector<8x128xf32>
    %15 = arith.mulf %14, %9 : vector<8x128xf32>
    %16 = arith.addf %13, %15 : vector<8x128xf32>
    %17 = vector.broadcast %4 : f32 to vector<8x128xf32>
    %18 = arith.mulf %17, %11 : vector<8x128xf32>
    %19 = arith.addf %16, %18 : vector<8x128xf32>
    %20 = arith.negf %19 : vector<8x128xf32>
    %21 = math.exp %20 : vector<8x128xf32>
    %cst_17 = arith.constant 1.000000e+00 : f32
    %22 = vector.broadcast %cst_17 : f32 to vector<8x128xf32>
    %23 = arith.addf %22, %21 : vector<8x128xf32>
    %24 = arith.divf %22, %23 : vector<8x128xf32>
    %25 = vector.broadcast %5 : f32 to vector<8x128xf32>
    %26 = arith.mulf %25, %24 : vector<8x128xf32>
    %27 = arith.addf %0, %26 : vector<8x128xf32>
    %cst_18 = arith.constant 0.000000e+00 : f32
    %28 = vector.broadcast %cst_18 : f32 to vector<8x128xf32>
    %29 = arith.maximumf %16, %28 : vector<8x128xf32>
    %30 = arith.addf %1, %29 : vector<8x128xf32>
    %c1_19 = arith.constant 1 : index
    %c0_20 = arith.constant 0 : index
    %31 = memref.load %arg1[%c1_19, %c0_20] : memref<3x4xf32, #tpu.memory_space<smem>>
    %c1_21 = arith.constant 1 : index
    %c1_22 = arith.constant 1 : index
    %32 = memref.load %arg1[%c1_21, %c1_22] : memref<3x4xf32, #tpu.memory_space<smem>>
    %c1_23 = arith.constant 1 : index
    %c2_24 = arith.constant 2 : index
    %33 = memref.load %arg1[%c1_23, %c2_24] : memref<3x4xf32, #tpu.memory_space<smem>>
    %c1_25 = arith.constant 1 : index
    %c3_26 = arith.constant 3 : index
    %34 = memref.load %arg1[%c1_25, %c3_26] : memref<3x4xf32, #tpu.memory_space<smem>>
    %c1_27 = arith.constant 1 : index
    %c0_28 = arith.constant 0 : index
    %c0_29 = arith.constant 0 : index
    %c0_30 = arith.constant 0 : index
    %35 = vector.load %arg2[%c1_27, %c0_28, %c0_29, %c0_30] : memref<3x3x8x128xf32, #tpu.memory_space<vmem>>, vector<1x1x8x128xf32>
    %36 = vector.shape_cast %35 : vector<1x1x8x128xf32> to vector<8x128xf32>
    %c1_31 = arith.constant 1 : index
    %c1_32 = arith.constant 1 : index
    %c0_33 = arith.constant 0 : index
    %c0_34 = arith.constant 0 : index
    %37 = vector.load %arg2[%c1_31, %c1_32, %c0_33, %c0_34] : memref<3x3x8x128xf32, #tpu.memory_space<vmem>>, vector<1x1x8x128xf32>
    %38 = vector.shape_cast %37 : vector<1x1x8x128xf32> to vector<8x128xf32>
    %c1_35 = arith.constant 1 : index
    %c2_36 = arith.constant 2 : index
    %c0_37 = arith.constant 0 : index
    %c0_38 = arith.constant 0 : index
    %39 = vector.load %arg2[%c1_35, %c2_36, %c0_37, %c0_38] : memref<3x3x8x128xf32, #tpu.memory_space<vmem>>, vector<1x1x8x128xf32>
    %40 = vector.shape_cast %39 : vector<1x1x8x128xf32> to vector<8x128xf32>
    %41 = vector.broadcast %31 : f32 to vector<8x128xf32>
    %42 = arith.mulf %41, %36 : vector<8x128xf32>
    %43 = vector.broadcast %32 : f32 to vector<8x128xf32>
    %44 = arith.mulf %43, %38 : vector<8x128xf32>
    %45 = arith.addf %42, %44 : vector<8x128xf32>
    %46 = vector.broadcast %33 : f32 to vector<8x128xf32>
    %47 = arith.mulf %46, %40 : vector<8x128xf32>
    %48 = arith.addf %45, %47 : vector<8x128xf32>
    %49 = arith.negf %48 : vector<8x128xf32>
    %50 = math.exp %49 : vector<8x128xf32>
    %cst_39 = arith.constant 1.000000e+00 : f32
    %51 = vector.broadcast %cst_39 : f32 to vector<8x128xf32>
    %52 = arith.addf %51, %50 : vector<8x128xf32>
    %53 = arith.divf %51, %52 : vector<8x128xf32>
    %54 = vector.broadcast %34 : f32 to vector<8x128xf32>
    %55 = arith.mulf %54, %53 : vector<8x128xf32>
    %56 = arith.addf %27, %55 : vector<8x128xf32>
    %cst_40 = arith.constant 0.000000e+00 : f32
    %57 = vector.broadcast %cst_40 : f32 to vector<8x128xf32>
    %58 = arith.maximumf %45, %57 : vector<8x128xf32>
    %59 = arith.addf %30, %58 : vector<8x128xf32>
    %c2_41 = arith.constant 2 : index
    %c0_42 = arith.constant 0 : index
    %60 = memref.load %arg1[%c2_41, %c0_42] : memref<3x4xf32, #tpu.memory_space<smem>>
    %c2_43 = arith.constant 2 : index
    %c1_44 = arith.constant 1 : index
    %61 = memref.load %arg1[%c2_43, %c1_44] : memref<3x4xf32, #tpu.memory_space<smem>>
    %c2_45 = arith.constant 2 : index
    %c2_46 = arith.constant 2 : index
    %62 = memref.load %arg1[%c2_45, %c2_46] : memref<3x4xf32, #tpu.memory_space<smem>>
    %c2_47 = arith.constant 2 : index
    %c3_48 = arith.constant 3 : index
    %63 = memref.load %arg1[%c2_47, %c3_48] : memref<3x4xf32, #tpu.memory_space<smem>>
    %c2_49 = arith.constant 2 : index
    %c0_50 = arith.constant 0 : index
    %c0_51 = arith.constant 0 : index
    %c0_52 = arith.constant 0 : index
    %64 = vector.load %arg2[%c2_49, %c0_50, %c0_51, %c0_52] : memref<3x3x8x128xf32, #tpu.memory_space<vmem>>, vector<1x1x8x128xf32>
    %65 = vector.shape_cast %64 : vector<1x1x8x128xf32> to vector<8x128xf32>
    %c2_53 = arith.constant 2 : index
    %c1_54 = arith.constant 1 : index
    %c0_55 = arith.constant 0 : index
    %c0_56 = arith.constant 0 : index
    %66 = vector.load %arg2[%c2_53, %c1_54, %c0_55, %c0_56] : memref<3x3x8x128xf32, #tpu.memory_space<vmem>>, vector<1x1x8x128xf32>
    %67 = vector.shape_cast %66 : vector<1x1x8x128xf32> to vector<8x128xf32>
    %c2_57 = arith.constant 2 : index
    %c2_58 = arith.constant 2 : index
    %c0_59 = arith.constant 0 : index
    %c0_60 = arith.constant 0 : index
    %68 = vector.load %arg2[%c2_57, %c2_58, %c0_59, %c0_60] : memref<3x3x8x128xf32, #tpu.memory_space<vmem>>, vector<1x1x8x128xf32>
    %69 = vector.shape_cast %68 : vector<1x1x8x128xf32> to vector<8x128xf32>
    %70 = vector.broadcast %60 : f32 to vector<8x128xf32>
    %71 = arith.mulf %70, %65 : vector<8x128xf32>
    %72 = vector.broadcast %61 : f32 to vector<8x128xf32>
    %73 = arith.mulf %72, %67 : vector<8x128xf32>
    %74 = arith.addf %71, %73 : vector<8x128xf32>
    %75 = vector.broadcast %62 : f32 to vector<8x128xf32>
    %76 = arith.mulf %75, %69 : vector<8x128xf32>
    %77 = arith.addf %74, %76 : vector<8x128xf32>
    %78 = arith.negf %77 : vector<8x128xf32>
    %79 = math.exp %78 : vector<8x128xf32>
    %cst_61 = arith.constant 1.000000e+00 : f32
    %80 = vector.broadcast %cst_61 : f32 to vector<8x128xf32>
    %81 = arith.addf %80, %79 : vector<8x128xf32>
    %82 = arith.divf %80, %81 : vector<8x128xf32>
    %83 = vector.broadcast %63 : f32 to vector<8x128xf32>
    %84 = arith.mulf %83, %82 : vector<8x128xf32>
    %85 = arith.addf %56, %84 : vector<8x128xf32>
    %cst_62 = arith.constant 0.000000e+00 : f32
    %86 = vector.broadcast %cst_62 : f32 to vector<8x128xf32>
    %87 = arith.maximumf %74, %86 : vector<8x128xf32>
    %88 = arith.addf %59, %87 : vector<8x128xf32>
    %c0_63 = arith.constant 0 : index
    %c0_64 = arith.constant 0 : index
    %89 = vector.load %arg3[%c0_63, %c0_64] : memref<8x128xf32, #tpu.memory_space<vmem>>, vector<8x128xf32>
    tpu.vector_store %arg3[%c0_63, %c0_64], %85 {strides = array<i32>} : memref<8x128xf32, #tpu.memory_space<vmem>>, vector<8x128xf32>,
    %90 = vector.shape_cast %88 : vector<8x128xf32> to vector<1x8x128xf32>
    %cst_65 = arith.constant dense<0.000000e+00> : vector<1xf32>
    %91 = vector.multi_reduction <add>, %90, %cst_65 [1, 2] : vector<1x8x128xf32> to vector<1xf32>
    %92 = vector.shape_cast %91 : vector<1xf32> to vector<1x1x1xf32>
    %93 = vector.extract %92[0, 0, 0] : f32 from vector<1x1x1xf32>
    %c0_66 = arith.constant 0 : index
    %c0_67 = arith.constant 0 : index
    %94 = memref.load %arg4[%c0_66, %c0_67] : memref<1x1xf32, #tpu.memory_space<smem>>
    memref.store %93, %arg4[%c0_66, %c0_67] : memref<1x1xf32, #tpu.memory_space<smem>>
    return
  }
  func.func @transform_0(%arg0: i32) -> (i32, i32) {
    %c0_i32 = arith.constant 0 : i32
    %c0_i32_0 = arith.constant 0 : i32
    %c0_i32_1 = arith.constant 0 : i32
    return %c0_i32, %c0_i32_0 : i32, i32
  }
  func.func @transform_1(%arg0: i32) -> (i32, i32, i32, i32) {
    %c0_i32 = arith.constant 0 : i32
    %c0_i32_0 = arith.constant 0 : i32
    %c0_i32_1 = arith.constant 0 : i32
    %c0_i32_2 = arith.constant 0 : i32
    return %c0_i32, %c0_i32_0, %arg0, %c0_i32_1 : i32, i32, i32, i32
  }
  func.func @transform_2(%arg0: i32) -> (i32, i32) {
    %c0_i32 = arith.constant 0 : i32
    %c0_i32_0 = arith.constant 0 : i32
    return %arg0, %c0_i32 : i32, i32
  }
  func.func @transform_3(%arg0: i32) -> (i32, i32) {
    %c0_i32 = arith.constant 0 : i32
    %c0_i32_0 = arith.constant 0 : i32
    return %arg0, %c0_i32 : i32, i32
  }
}

</mosaic_0001>

<bundles_post_ra>
// kernel: tpu_custom_call.1
= control target key start
LH: loop header
LB: loop body
LE: loop exit
PB: predicated region body
PF: predicated region fallthrough
CT: control target
= control target key end

     0   :  { %9 = vsyncpa [#allocation5], 0  ;;  %s347_s0 = inlined_call_operand.hbm [shape: f32[3,4], index: 0, kind: input, shape index: {}]   ;;  %s348_s1 = inlined_call_operand.hbm [shape: f32[3,3,8,128], index: 1, kind: input, shape index: {}]   ;;  %s349_s2 = inlined_call_operand.hbm [shape: f32[8,128], index: 2, kind: output, shape index: {0}]   ;;  %s350_s3 = inlined_call_operand.hbm [shape: f32[1,1], index: 3, kind: output, shape index: {1}]  }
   0x1   :  { %10 = vsyncpa [#allocation3], 0 }
   0x2   :  { %11 = vsyncpa [#allocation4], 0 }
   0x3   :  { %12 = vsyncpa [#allocation6], 0  ;;  %s201_s14 = scalar_lea.hbm %s347_s0, 64 }
   0x4   :  { %p202_p0 = scmp.ne.s32.totalorder %s347_s0, %s201_s14  ;;  %p205_p1 = scmp.lt.u32.totalorder %s201_s14, %s347_s0 }
   0x6   :  { %p207_p2 = pnand %p205_p1, %p202_p0 }
   0x8   :  { %210 = shalt.err (!%p207_p2)
}
   0x9   :  { %s273_s19 = smov [#allocation2]   ;;  %s274_s22 = smov [#allocation7]  }
   0xa   :  { %20 = dma.hbm_to_smem %s347_s0, 64, %s273_s19, [#allocation5]  }
   0xb   :  { %s26_s23 = sshll.u32 %s274_s22, 4  ;;  %s211_s26 = scalar_lea.hbm %s348_s1, 1152  ;;  %s27_s23 = int_to_ptr.vmem [resolvable:$true] %s26_s23 }
   0xc   :  { %p212_p3 = scmp.ne.s32.totalorder %s348_s1, %s211_s26  ;;  %p215_p4 = scmp.lt.u32.totalorder %s211_s26, %s348_s1 }
   0xe   :  { %p217_p5 = pnand %p215_p4, %p212_p3 }
  0x10   :  { %220 = shalt.err (!%p217_p5)
}
  0x11   :  { %s221_s4 = scalar_lea.vmem %s27_s23, 1152  ;;  %p226_p7 = scmp.lt.s32.totalorder %s27_s23, %s27_s23 }
  0x12   :  { %p222_p6 = scmp.ne.s32.totalorder %s27_s23, %s221_s4  ;;  %p227_p8 = scmp.lt.s32.totalorder %s221_s4, %s221_s4 }
  0x14   :  { %p228_p9 = por %p227_p8, %p226_p7 }
  0x16   :  { %p229_p10 = pnand %p228_p9, %p222_p6 }
  0x18   :  { %232 = shalt.err (!%p229_p10)
}
  0x19   :  { %s275_s0 = smov 128   ;;  %s276_s5 = smov 8  }
  0x1a   :  { %32 = dma.hbm_to_vmem [thread:$0]  %s348_s1, 1152, %s27_s23, [#allocation3], %s275_s0, %s275_s0, %s276_s5  }
  0x1b   :  { %265 = dma.done.wait [#allocation5], 64  }
  0x1c   :  { %266 = vsyncadd [#allocation5], 4294967232 }
  0x1d   :  { %267 = dma.done.wait [#allocation3], 1152  }
  0x1e   :  { %268 = vsyncadd [#allocation3], 4294966144 }
  0x1f   :  { %39 = sfence }
  0x20   :  { %s40_s8 = sld [smem:[#allocation2]]  ;;  %s167_s9 = sld [smem:[#allocation2 + $0x1]]  ;;  %v44_v0 = vld [vmem:[#allocation7] sm:$0xff]  ;;  %v46_v1 = vld [vmem:[#allocation7 + $0x8] sm:$0xff]  ;;  %v73_v2 = vld [vmem:[#allocation7 + $0x18] sm:$0xff] }
  0x21   :  { %s171_s10 = sld [smem:[#allocation2 + $0x80]]  ;;  %s172_s11 = sld [smem:[#allocation2 + $0x81]]  ;;  %v75_v5 = vld [vmem:[#allocation7 + $0x20] sm:$0xff]  ;;  %v102_v9 = vld [vmem:[#allocation7 + $0x30] sm:$0xff]  ;;  %v104_v12 = vld [vmem:[#allocation7 + $0x38] sm:$0xff] }
  0x22   :  { %s176_s12 = sld [smem:[#allocation2 + $0x100]]  ;;  %s177_s13 = sld [smem:[#allocation2 + $0x101]]  ;;  %v48_v26 = vld [vmem:[#allocation7 + $0x10] sm:$0xff]  ;;  %v77_v28 = vld [vmem:[#allocation7 + $0x28] sm:$0xff]  ;;  %v106_v31 = vld [vmem:[#allocation7 + $0x40] sm:$0xff] }
  0x23   :  { %s168_s1 = sld [smem:[#allocation2 + $0x2]]  ;;  %s169_s16 = sld [smem:[#allocation2 + $0x3]] }
  0x24   :  { %s173_s14 = sld [smem:[#allocation2 + $0x82]]  ;;  %s174_s17 = sld [smem:[#allocation2 + $0x83]] }
  0x25   :  { %s178_s15 = sld [smem:[#allocation2 + $0x102]]  ;;  %s179_s18 = sld [smem:[#allocation2 + $0x103]] }
  0x26   :  { %v49_v3 = vstv %s40_s8  ;;  %v51_v4 = vstv %s167_s9  ;;  %s277_s19 = smov [#allocation8]  }
  0x27   :  { %v50_v6 = vmul.f32 %v49_v3, %v44_v0  ;;  %v52_v7 = vmul.f32 %v51_v4, %v46_v1  ;;  %v78_v8 = vstv %s171_s10  ;;  %v80_v11 = vstv %s172_s11  ;;  %s144_s20 = sshll.u32 %s277_s19, 4  ;;  %s145_s20 = int_to_ptr.vmem [resolvable:$true] %s144_s20 }
  0x28   :  { %v79_v10 = vmul.f32 %v78_v8, %v73_v2  ;;  %v81_v14 = vmul.f32 %v80_v11, %v75_v5  ;;  %v107_v15 = vstv %s176_s12  ;;  %v109_v17 = vstv %s177_s13  ;;  %s233_s21 = scalar_lea.vmem %s145_s20, 128  ;;  %p238_p12 = scmp.lt.s32.totalorder %s145_s20, %s145_s20 }
  0x29   :  { %v53_v13 = vadd.f32 %v52_v7, %v50_v6  ;;  %v108_v16 = vmul.f32 %v107_v15, %v102_v9  ;;  %v110_v20 = vmul.f32 %v109_v17, %v104_v12  ;;  %v54_v27 = vstv %s168_s1  ;;  %p234_p11 = scmp.ne.s32.totalorder %s145_s20, %s233_s21  ;;  %p239_p13 = scmp.lt.s32.totalorder %s233_s21, %s233_s21 }
  0x2a   :  { %v82_v19 = vadd.f32 %v81_v14, %v79_v10  ;;  %v83_v29 = vstv %s173_s14  ;;  %v55_v30 = vmul.f32 %v54_v27, %v48_v26  ;;  %v63_v50 = vstv %s169_s16 }
  0x2b   :  { %v66_v18 = vmax.f32 %v53_v13, 0.0  ;;  %v111_v22 = vadd.f32 %v110_v20, %v108_v16  ;;  %v112_v32 = vstv %s178_s15  ;;  %v84_v33 = vmul.f32 %v83_v29, %v77_v28  ;;  %p240_p0 = por %p239_p13, %p238_p12 }
  0x2c   :  { %v95_v21 = vmax.f32 %v82_v19, 0.0  ;;  %v113_v34 = vmul.f32 %v112_v32, %v106_v31  ;;  %v56_v35 = vadd.f32 %v55_v30, %v53_v13  ;;  %v92_v51 = vstv %s174_s17 }
  0x2d   :  { %v124_v24 = vmax.f32 %v111_v22, 0.0  ;;  %v85_v36 = vadd.f32 %v84_v33, %v82_v19  ;;  %v121_v54 = vstv %s179_s18  ;;  %p241_p1 = pnand %p240_p0, %p234_p11 }
  0x2e   :  { %v96_v23 = vadd.f32 %v95_v21, %v66_v18  ;;  %v114_v37 = vadd.f32 %v113_v34, %v111_v22  ;;  %v170_v38 = vmul.f32 -1.442695, %v56_v35 }
  0x2f   :  { %v175_v39 = vmul.f32 -1.442695, %v85_v36 }
  0x30   :  { %v125_v25 = vadd.f32 %v124_v24, %v96_v23  ;;  %v180_v40 = vmul.f32 -1.442695, %v114_v37  ;;  %189 = vpow2.f32 %v170_v38 }
  0x31   :  { %191 = vpow2.f32 %v175_v39 }
  0x32   :  { %127 = vadd.xlane.f32.xlu0 %v125_v25  ;;  %193 = vpow2.f32 %v180_v40 }
  0x3a   :  { %v190_v41 = vpop.eup %189 }
  0x3b   :  { %v192_v42 = vpop.eup %191  ;;  %v60_v44 = vadd.f32 1.0, %v190_v41 }
  0x3c   :  { %v194_v43 = vpop.eup %193  ;;  %v89_v45 = vadd.f32 1.0, %v192_v42 }
  0x3d   :  { %v118_v46 = vadd.f32 1.0, %v194_v43  ;;  %195 = vrcp.f32 %v60_v44 }
  0x3e   :  { %197 = vrcp.f32 %v89_v45 }
  0x3f   :  { %199 = vrcp.f32 %v118_v46 }
  0x47   :  { %v196_v47 = vpop.eup %195 }
  0x48   :  { %v198_v48 = vpop.eup %197  ;;  %v64_v52 = vmul.f32 %v196_v47, %v63_v50 }
  0x49   :  { %v200_v49 = vpop.eup %199  ;;  %v93_v53 = vmul.f32 %v198_v48, %v92_v51 }
  0x4a   :  { %v122_v56 = vmul.f32 %v200_v49, %v121_v54 }
  0x4b   :  { %v94_v55 = vadd.f32 %v93_v53, %v64_v52 }
  0x4d   :  { %v123_v57 = vadd.f32 %v122_v56, %v94_v55 }
  0x4f   :  { %126 = vst [vmem:[#allocation8] sm:$0xff] %v123_v57 }
  0x50   :  { %244 = shalt.err (!%p241_p1)
}
  0x51   :  { %s245_s24 = scalar_lea.hbm %s349_s2, 128 }
  0x52   :  { %p246_p2 = scmp.ne.s32.totalorder %s349_s2, %s245_s24  ;;  %p249_p3 = scmp.lt.u32.totalorder %s245_s24, %s349_s2 }
  0x54   :  { %p251_p4 = pnand %p249_p3, %p246_p2 }
  0x56   :  { %254 = shalt.err (!%p251_p4)
}
  0x57   :  { %147 = dma.vmem_to_hbm [thread:$0]  %s145_s20, 128, %s349_s2, [#allocation4]  }
  0x58   :  { %s255_s6 = scalar_lea.hbm %s350_s3, 16 }
  0x59   :  { %p256_p5 = scmp.ne.s32.totalorder %s350_s3, %s255_s6  ;;  %p259_p6 = scmp.lt.u32.totalorder %s255_s6, %s350_s3 }
  0x5b   :  { %p261_p7 = pnand %p259_p6, %p256_p5 }
  0xbf   :  { %v128_v58 = vpop.xlane.xlu0 %127 }
  0xc0   :  { %v129_v59 = vrot.slane %v128_v58, 4 }
  0xc2   :  { %v130_v60 = vadd.f32 %v129_v59, %v128_v58 }
  0xc4   :  { %v131_v61 = vrot.slane %v130_v60, 2 }
  0xc6   :  { %v132_v62 = vadd.f32 %v131_v61, %v130_v60 }
  0xc8   :  { %v133_v63 = vrot.slane %v132_v62, 1 }
  0xca   :  { %v134_v0 = vadd.f32 %v133_v63, %v132_v62 }
  0xcc   :  { %181 = vpush %v134_v0 }
  0xfd   :  { %s182_s4 = spop %181 }
  0xfe   :  { %137 = sst [smem:[#allocation9]] %s182_s4 }
  0xff   :  { %264 = shalt.err (!%p261_p7)
}
 0x100   :  { %s278_s10 = smov [#allocation9]  }
 0x101   :  { %155 = dma.smem_to_hbm %s278_s10, 16, %s350_s3, [#allocation6]  }
 0x102   :  { %269 = dma.done.wait [#allocation4], 128  }
 0x103   :  { %270 = vsyncadd [#allocation4], 4294967168 }
 0x104   :  { %271 = dma.done.wait [#allocation6], 16  }
 0x105   :  { %272 = vsyncadd [#allocation6], 4294967280 }
 0x106   :  { %162 = sfence }
 0x107   :  { %163 = vsyncpa [#allocation3], 1 }
 0x108   :  { %164 = vsyncpa [#allocation4], 1 }
 0x109   :  { %165 = vsyncpa [#allocation5], 1 }
 0x10a   :  { %166 = vsyncpa [#allocation6], 1 }

</bundles_post_ra>
